<compile_context>
chip_gen: v5e
topology: v5e:2x2
jax: 0.10.0
libtpu: 0.0.40
codegen_flags: <defaults>
</compile_context>

<pallas_src>
import jax
import jax.numpy as jnp
from jax.experimental import pallas as pl
from jax.experimental.pallas import tpu as pltpu


def _gscore_kernel(y_ref, z_ref, d_ref, out_ref,
                   acc_tot, acc_gp, acc_gn, acc_fa, acc_miss):
    h = pl.program_id(1)
    last_h = pl.num_programs(1) - 1

    # Reset the per-batch accumulator planes on the first row tile.
    @pl.when(h == 0)
    def _init():
        acc_tot[...] = jnp.zeros_like(acc_tot)
        acc_gp[...] = jnp.zeros_like(acc_gp)
        acc_gn[...] = jnp.zeros_like(acc_gn)
        acc_fa[...] = jnp.zeros_like(acc_fa)
        acc_miss[...] = jnp.zeros_like(acc_miss)

    y = y_ref[0]          # (TH, W)
    d = d_ref[0]          # (TH, W)
    z0 = z_ref[0, 0]      # (TH, W)
    z1 = z_ref[0, 1]      # (TH, W)

    pos = z1 > z0         # zs > 0 (zs = z1 - z0), without the subtract
    neg = z1 < z0         # zs < 0
    y1 = y == 1.0
    y0 = y == 0.0

    one = jnp.float32(1.0)
    zero = jnp.float32(0.0)

    # Pure elementwise accumulation (VPU only) -- no cross-lane work here.
    acc_tot[...] += d
    acc_gp[...] += jnp.where(pos & y1, one, zero)
    acc_gn[...] += jnp.where(neg & y0, d, zero)
    acc_fa[...] += jnp.where(pos & y0, d, zero)
    acc_miss[...] += jnp.where(neg & y1, one, zero)

    # Single cross-lane reduction + output store per batch, on the last tile.
    @pl.when(h == last_h)
    def _finalize():
        tot = jnp.sum(acc_tot[...])
        gp = jnp.sum(acc_gp[...])
        gn = jnp.sum(acc_gn[...])
        fa = jnp.sum(acc_fa[...])
        miss = jnp.sum(acc_miss[...])
        row = jax.lax.broadcasted_iota(jnp.int32, (8, 128), 0)
        out_ref[0] = (jnp.where(row == 0, tot, 0.0)
                      + jnp.where(row == 1, gp, 0.0)
                      + jnp.where(row == 2, gn, 0.0)
                      + jnp.where(row == 3, fa, 0.0)
                      + jnp.where(row == 4, miss, 0.0))


def _row_tile(H, W):
    """Row-tile: multiple of 8 sublanes, full-W lanes, ~1 MiB per f32 plane."""
    target_elems = 256 * 1024            # 1 MiB / 4 bytes per f32 input plane
    th = (target_elems // max(W, 1)) // 8 * 8
    th = max(th, 8)
    h_pad8 = ((H + 7) // 8) * 8
    return min(th, h_pad8)


@jax.jit
def gscore_forward(y, z, D):
    """Returns (tot, goodP, goodN, fa, miss) as a length-5 f32 vector."""
    y = jnp.asarray(y, jnp.float32)
    z = jnp.asarray(z, jnp.float32)
    D = jnp.asarray(D, jnp.float32)

    B, H, W = y.shape
    assert z.shape == (B, 2, H, W), z.shape
    assert D.shape == (B, H, W), D.shape

    th = _row_tile(H, W)
    Hp = ((H + th - 1) // th) * th
    if Hp != H:
        # Zero padding is exact: padded z gives z1 == z0 (neither pos nor
        # neg) and padded D is 0, so padded pixels contribute to no sum.
        pad = Hp - H
        y = jnp.pad(y, ((0, 0), (0, pad), (0, 0)))
        z = jnp.pad(z, ((0, 0), (0, 0), (0, pad), (0, 0)))
        D = jnp.pad(D, ((0, 0), (0, pad), (0, 0)))

    n_row_tiles = Hp // th

    partials = pl.pallas_call(
        _gscore_kernel,
        out_shape=jax.ShapeDtypeStruct((B, 8, 128), jnp.float32),
        grid_spec=pltpu.PrefetchScalarGridSpec(
            num_scalar_prefetch=0,
            grid=(B, n_row_tiles),
            in_specs=[
                pl.BlockSpec((1, th, W), lambda b, h: (b, h, 0)),
                pl.BlockSpec((1, 2, th, W), lambda b, h: (b, 0, h, 0)),
                pl.BlockSpec((1, th, W), lambda b, h: (b, h, 0)),
            ],
            out_specs=pl.BlockSpec((1, 8, 128), lambda b, h: (b, 0, 0)),
            scratch_shapes=[pltpu.VMEM((th, W), jnp.float32)] * 5,
        ),
        compiler_params=pltpu.CompilerParams(
            # Batch axis is independent (lets v7x use both TensorCores);
            # the row-tile (reduction) axis is arbitrary and last in the grid.
            dimension_semantics=("parallel", "arbitrary"),
            vmem_limit_bytes=32 * 1024 * 1024,
        ),
    )(y, z, D)

    # Rows 0..4 / lane 0 of each batch's partial block hold the five sums.
    return jnp.sum(partials[:, :5, 0], axis=0)


class Gscore:
    """Stateful wrapper mirroring the PyTorch module's buffers."""

    def __init__(self):
        self.tot = jnp.zeros(1, jnp.float32)
        self.correct = jnp.zeros(1, jnp.float32)
        self.good = jnp.zeros(1, jnp.float32)
        self.fa = jnp.zeros(1, jnp.float32)
        self.miss = jnp.zeros(1, jnp.float32)

    def forward(self, y, z, D):
        stats = gscore_forward(y, z, D)
        tot, goodP, goodN, fa, miss = (stats[i] for i in range(5))
        self.tot = self.tot + tot
        self.correct = self.correct + goodP + goodN
        self.good = self.good + goodP
        self.fa = self.fa + fa
        self.miss = self.miss + miss
        return stats

    def getPerf(self):
        precision = self.good / (self.good + self.fa + 0.0001)
        recall = self.good / (self.good + self.miss + 0.0001)
        return (precision * recall * 100.0, self.correct / self.tot * 100)


def _reference(y, z, D):
    zs = z[:, 1, :, :] - z[:, 0, :, :]
    tot = jnp.sum(D)
    goodP = jnp.sum((zs > 0).astype(jnp.float32) * (y == 1).astype(jnp.float32))
    goodN = jnp.sum((zs < 0).astype(jnp.float32) * (y == 0).astype(jnp.float32) * D)
    fa = jnp.sum((zs > 0).astype(jnp.float32) * (y == 0).astype(jnp.float32) * D)
    miss = jnp.sum((zs < 0).astype(jnp.float32) * (y == 1).astype(jnp.float32))
    return jnp.stack([tot, goodP, goodN, fa, miss])


def _run_case(key, B, H, W):
    k1, k2, k3 = jax.random.split(key, 3)
    y = jax.random.bernoulli(k1, 0.5, (B, H, W)).astype(jnp.float32)
    z = jax.random.normal(k2, (B, 2, H, W), jnp.float32)
    D = jax.random.bernoulli(k3, 0.7, (B, H, W)).astype(jnp.float32)

    stats = jax.block_until_ready(gscore_forward(y, z, D))
    ref = jax.block_until_ready(_reference(y, z, D))
    assert jnp.allclose(stats, ref, rtol=1e-5, atol=1e-5), (stats, ref)
    return y, z, D


if __name__ == "__main__":
    key = jax.random.PRNGKey(0)
    k_a, k_b = jax.random.split(key)

    # Small shapes consistent with the module's forward (B, H, W) / (B, 2, H, W).
    y, z, D = _run_case(k_a, B=2, H=16, W=16)
    _run_case(k_b, B=2, H=20, W=16)   # non-multiple-of-8 H exercises the pad path

    # Exercise the stateful wrapper + getPerf like the PyTorch module.
    metric = Gscore()
    metric.forward(y, z, D)
    jax.block_until_ready(metric.getPerf())

    print("KERNEL_OK")
</pallas_src>

<mosaic_0001>
module attributes {stable_mosaic.version = 11 : i64} {
  func.func @_gscore_kernel(%arg0: i32, %arg1: i32, %arg2: memref<1x16x16xf32, #tpu.memory_space<vmem>>, %arg3: memref<1x2x16x16xf32, #tpu.memory_space<vmem>>, %arg4: memref<1x16x16xf32, #tpu.memory_space<vmem>>, %arg5: memref<1x8x128xf32, #tpu.memory_space<vmem>>, %arg6: memref<16x16xf32, #tpu.memory_space<vmem>>, %arg7: memref<16x16xf32, #tpu.memory_space<vmem>>, %arg8: memref<16x16xf32, #tpu.memory_space<vmem>>, %arg9: memref<16x16xf32, #tpu.memory_space<vmem>>, %arg10: memref<16x16xf32, #tpu.memory_space<vmem>>) attributes {dimension_semantics = [#tpu.dimension_semantics<parallel>, #tpu.dimension_semantics<arbitrary>], iteration_bounds = array<i64: 2, 1>, scalar_prefetch = 0 : i64, scratch_operands = 5 : i64, tpu.core_type = #tpu.core_type<tc>, window_params = [{transform_indices = @transform_0, window_bounds = array<i64: 1, 16, 16>}, {transform_indices = @transform_1, window_bounds = array<i64: 1, 2, 16, 16>}, {transform_indices = @transform_2, window_bounds = array<i64: 1, 16, 16>}, {transform_indices = @transform_3, window_bounds = array<i64: 1, 8, 128>}]} {
    %c0_i32 = arith.constant 0 : i32
    %0 = arith.cmpi eq, %arg1, %c0_i32 : i32
    %1 = arith.extui %0 : i1 to i32
    %c0_i32_0 = arith.constant 0 : i32
    %2 = arith.cmpi ne, %1, %c0_i32_0 : i32
    scf.if %2 {
      %cst_42 = arith.constant 0.000000e+00 : f32
      %49 = vector.broadcast %cst_42 : f32 to vector<16x16xf32>
      %c0_43 = arith.constant 0 : index
      %c0_44 = arith.constant 0 : index
      %50 = vector.load %arg6[%c0_43, %c0_44] : memref<16x16xf32, #tpu.memory_space<vmem>>, vector<16x16xf32>
      tpu.vector_store %arg6[%c0_43, %c0_44], %49 {strides = array<i32>} : memref<16x16xf32, #tpu.memory_space<vmem>>, vector<16x16xf32>,
      %cst_45 = arith.constant 0.000000e+00 : f32
      %51 = vector.broadcast %cst_45 : f32 to vector<16x16xf32>
      %c0_46 = arith.constant 0 : index
      %c0_47 = arith.constant 0 : index
      %52 = vector.load %arg7[%c0_46, %c0_47] : memref<16x16xf32, #tpu.memory_space<vmem>>, vector<16x16xf32>
      tpu.vector_store %arg7[%c0_46, %c0_47], %51 {strides = array<i32>} : memref<16x16xf32, #tpu.memory_space<vmem>>, vector<16x16xf32>,
      %cst_48 = arith.constant 0.000000e+00 : f32
      %53 = vector.broadcast %cst_48 : f32 to vector<16x16xf32>
      %c0_49 = arith.constant 0 : index
      %c0_50 = arith.constant 0 : index
      %54 = vector.load %arg8[%c0_49, %c0_50] : memref<16x16xf32, #tpu.memory_space<vmem>>, vector<16x16xf32>
      tpu.vector_store %arg8[%c0_49, %c0_50], %53 {strides = array<i32>} : memref<16x16xf32, #tpu.memory_space<vmem>>, vector<16x16xf32>,
      %cst_51 = arith.constant 0.000000e+00 : f32
      %55 = vector.broadcast %cst_51 : f32 to vector<16x16xf32>
      %c0_52 = arith.constant 0 : index
      %c0_53 = arith.constant 0 : index
      %56 = vector.load %arg9[%c0_52, %c0_53] : memref<16x16xf32, #tpu.memory_space<vmem>>, vector<16x16xf32>
      tpu.vector_store %arg9[%c0_52, %c0_53], %55 {strides = array<i32>} : memref<16x16xf32, #tpu.memory_space<vmem>>, vector<16x16xf32>,
      %cst_54 = arith.constant 0.000000e+00 : f32
      %57 = vector.broadcast %cst_54 : f32 to vector<16x16xf32>
      %c0_55 = arith.constant 0 : index
      %c0_56 = arith.constant 0 : index
      %58 = vector.load %arg10[%c0_55, %c0_56] : memref<16x16xf32, #tpu.memory_space<vmem>>, vector<16x16xf32>
      tpu.vector_store %arg10[%c0_55, %c0_56], %57 {strides = array<i32>} : memref<16x16xf32, #tpu.memory_space<vmem>>, vector<16x16xf32>,
    } else {
    }
    %c0 = arith.constant 0 : index
    %c0_1 = arith.constant 0 : index
    %c0_2 = arith.constant 0 : index
    %3 = vector.load %arg2[%c0, %c0_1, %c0_2] : memref<1x16x16xf32, #tpu.memory_space<vmem>>, vector<1x16x16xf32>
    %4 = vector.shape_cast %3 : vector<1x16x16xf32> to vector<16x16xf32>
    %c0_3 = arith.constant 0 : index
    %c0_4 = arith.constant 0 : index
    %c0_5 = arith.constant 0 : index
    %5 = vector.load %arg4[%c0_3, %c0_4, %c0_5] : memref<1x16x16xf32, #tpu.memory_space<vmem>>, vector<1x16x16xf32>
    %6 = vector.shape_cast %5 : vector<1x16x16xf32> to vector<16x16xf32>
    %c0_6 = arith.constant 0 : index
    %c0_7 = arith.constant 0 : index
    %c0_8 = arith.constant 0 : index
    %c0_9 = arith.constant 0 : index
    %7 = vector.load %arg3[%c0_6, %c0_7, %c0_8, %c0_9] : memref<1x2x16x16xf32, #tpu.memory_space<vmem>>, vector<1x1x16x16xf32>
    %8 = vector.shape_cast %7 : vector<1x1x16x16xf32> to vector<16x16xf32>
    %c0_10 = arith.constant 0 : index
    %c1 = arith.constant 1 : index
    %c0_11 = arith.constant 0 : index
    %c0_12 = arith.constant 0 : index
    %9 = vector.load %arg3[%c0_10, %c1, %c0_11, %c0_12] : memref<1x2x16x16xf32, #tpu.memory_space<vmem>>, vector<1x1x16x16xf32>
    %10 = vector.shape_cast %9 : vector<1x1x16x16xf32> to vector<16x16xf32>
    %11 = arith.cmpf ogt, %10, %8 : vector<16x16xf32>
    %12 = arith.cmpf olt, %10, %8 : vector<16x16xf32>
    %cst = arith.constant 1.000000e+00 : f32
    %13 = vector.broadcast %cst : f32 to vector<16x16xf32>
    %14 = arith.cmpf oeq, %4, %13 : vector<16x16xf32>
    %cst_13 = arith.constant 0.000000e+00 : f32
    %15 = vector.broadcast %cst_13 : f32 to vector<16x16xf32>
    %16 = arith.cmpf oeq, %4, %15 : vector<16x16xf32>
    %c0_14 = arith.constant 0 : index
    %c0_15 = arith.constant 0 : index
    %17 = vector.load %arg6[%c0_14, %c0_15] : memref<16x16xf32, #tpu.memory_space<vmem>>, vector<16x16xf32>
    %18 = arith.addf %17, %6 : vector<16x16xf32>
    %c0_16 = arith.constant 0 : index
    %c0_17 = arith.constant 0 : index
    %19 = vector.load %arg6[%c0_16, %c0_17] : memref<16x16xf32, #tpu.memory_space<vmem>>, vector<16x16xf32>
    tpu.vector_store %arg6[%c0_16, %c0_17], %18 {strides = array<i32>} : memref<16x16xf32, #tpu.memory_space<vmem>>, vector<16x16xf32>,
    %c0_18 = arith.constant 0 : index
    %c0_19 = arith.constant 0 : index
    %20 = vector.load %arg7[%c0_18, %c0_19] : memref<16x16xf32, #tpu.memory_space<vmem>>, vector<16x16xf32>
    %21 = arith.andi %11, %14 : vector<16x16xi1>
    %cst_20 = arith.constant 1.000000e+00 : f32
    %cst_21 = arith.constant 0.000000e+00 : f32
    %22 = vector.broadcast %cst_20 : f32 to vector<16x16xf32>
    %23 = vector.broadcast %cst_21 : f32 to vector<16x16xf32>
    %24 = arith.select %21, %22, %23 : vector<16x16xi1>, vector<16x16xf32>
    %25 = arith.addf %20, %24 : vector<16x16xf32>
    %c0_22 = arith.constant 0 : index
    %c0_23 = arith.constant 0 : index
    %26 = vector.load %arg7[%c0_22, %c0_23] : memref<16x16xf32, #tpu.memory_space<vmem>>, vector<16x16xf32>
    tpu.vector_store %arg7[%c0_22, %c0_23], %25 {strides = array<i32>} : memref<16x16xf32, #tpu.memory_space<vmem>>, vector<16x16xf32>,
    %c0_24 = arith.constant 0 : index
    %c0_25 = arith.constant 0 : index
    %27 = vector.load %arg8[%c0_24, %c0_25] : memref<16x16xf32, #tpu.memory_space<vmem>>, vector<16x16xf32>
    %28 = arith.andi %12, %16 : vector<16x16xi1>
    %cst_26 = arith.constant 0.000000e+00 : f32
    %29 = vector.broadcast %cst_26 : f32 to vector<16x16xf32>
    %30 = arith.select %28, %6, %29 : vector<16x16xi1>, vector<16x16xf32>
    %31 = arith.addf %27, %30 : vector<16x16xf32>
    %c0_27 = arith.constant 0 : index
    %c0_28 = arith.constant 0 : index
    %32 = vector.load %arg8[%c0_27, %c0_28] : memref<16x16xf32, #tpu.memory_space<vmem>>, vector<16x16xf32>
    tpu.vector_store %arg8[%c0_27, %c0_28], %31 {strides = array<i32>} : memref<16x16xf32, #tpu.memory_space<vmem>>, vector<16x16xf32>,
    %c0_29 = arith.constant 0 : index
    %c0_30 = arith.constant 0 : index
    %33 = vector.load %arg9[%c0_29, %c0_30] : memref<16x16xf32, #tpu.memory_space<vmem>>, vector<16x16xf32>
    %34 = arith.andi %11, %16 : vector<16x16xi1>
    %cst_31 = arith.constant 0.000000e+00 : f32
    %35 = vector.broadcast %cst_31 : f32 to vector<16x16xf32>
    %36 = arith.select %34, %6, %35 : vector<16x16xi1>, vector<16x16xf32>
    %37 = arith.addf %33, %36 : vector<16x16xf32>
    %c0_32 = arith.constant 0 : index
    %c0_33 = arith.constant 0 : index
    %38 = vector.load %arg9[%c0_32, %c0_33] : memref<16x16xf32, #tpu.memory_space<vmem>>, vector<16x16xf32>
    tpu.vector_store %arg9[%c0_32, %c0_33], %37 {strides = array<i32>} : memref<16x16xf32, #tpu.memory_space<vmem>>, vector<16x16xf32>,
    %c0_34 = arith.constant 0 : index
    %c0_35 = arith.constant 0 : index
    %39 = vector.load %arg10[%c0_34, %c0_35] : memref<16x16xf32, #tpu.memory_space<vmem>>, vector<16x16xf32>
    %40 = arith.andi %12, %14 : vector<16x16xi1>
    %cst_36 = arith.constant 1.000000e+00 : f32
    %cst_37 = arith.constant 0.000000e+00 : f32
    %41 = vector.broadcast %cst_36 : f32 to vector<16x16xf32>
    %42 = vector.broadcast %cst_37 : f32 to vector<16x16xf32>
    %43 = arith.select %40, %41, %42 : vector<16x16xi1>, vector<16x16xf32>
    %44 = arith.addf %39, %43 : vector<16x16xf32>
    %c0_38 = arith.constant 0 : index
    %c0_39 = arith.constant 0 : index
    %45 = vector.load %arg10[%c0_38, %c0_39] : memref<16x16xf32, #tpu.memory_space<vmem>>, vector<16x16xf32>
    tpu.vector_store %arg10[%c0_38, %c0_39], %44 {strides = array<i32>} : memref<16x16xf32, #tpu.memory_space<vmem>>, vector<16x16xf32>,
    %c0_i32_40 = arith.constant 0 : i32
    %46 = arith.cmpi eq, %arg1, %c0_i32_40 : i32
    %47 = arith.extui %46 : i1 to i32
    %c0_i32_41 = arith.constant 0 : i32
    %48 = arith.cmpi ne, %47, %c0_i32_41 : i32
    scf.if %48 {
      %c0_42 = arith.constant 0 : index
      %c0_43 = arith.constant 0 : index
      %49 = vector.load %arg6[%c0_42, %c0_43] : memref<16x16xf32, #tpu.memory_space<vmem>>, vector<16x16xf32>
      %50 = vector.shape_cast %49 : vector<16x16xf32> to vector<1x16x16xf32>
      %cst_44 = arith.constant dense<0.000000e+00> : vector<1xf32>
      %51 = vector.multi_reduction <add>, %50, %cst_44 [1, 2] : vector<1x16x16xf32> to vector<1xf32>
      %52 = vector.shape_cast %51 : vector<1xf32> to vector<1x1x1xf32>
      %53 = vector.extract %52[0, 0, 0] : f32 from vector<1x1x1xf32>
      %c0_45 = arith.constant 0 : index
      %c0_46 = arith.constant 0 : index
      %54 = vector.load %arg7[%c0_45, %c0_46] : memref<16x16xf32, #tpu.memory_space<vmem>>, vector<16x16xf32>
      %55 = vector.shape_cast %54 : vector<16x16xf32> to vector<1x16x16xf32>
      %cst_47 = arith.constant dense<0.000000e+00> : vector<1xf32>
      %56 = vector.multi_reduction <add>, %55, %cst_47 [1, 2] : vector<1x16x16xf32> to vector<1xf32>
      %57 = vector.shape_cast %56 : vector<1xf32> to vector<1x1x1xf32>
      %58 = vector.extract %57[0, 0, 0] : f32 from vector<1x1x1xf32>
      %c0_48 = arith.constant 0 : index
      %c0_49 = arith.constant 0 : index
      %59 = vector.load %arg8[%c0_48, %c0_49] : memref<16x16xf32, #tpu.memory_space<vmem>>, vector<16x16xf32>
      %60 = vector.shape_cast %59 : vector<16x16xf32> to vector<1x16x16xf32>
      %cst_50 = arith.constant dense<0.000000e+00> : vector<1xf32>
      %61 = vector.multi_reduction <add>, %60, %cst_50 [1, 2] : vector<1x16x16xf32> to vector<1xf32>
      %62 = vector.shape_cast %61 : vector<1xf32> to vector<1x1x1xf32>
      %63 = vector.extract %62[0, 0, 0] : f32 from vector<1x1x1xf32>
      %c0_51 = arith.constant 0 : index
      %c0_52 = arith.constant 0 : index
      %64 = vector.load %arg9[%c0_51, %c0_52] : memref<16x16xf32, #tpu.memory_space<vmem>>, vector<16x16xf32>
      %65 = vector.shape_cast %64 : vector<16x16xf32> to vector<1x16x16xf32>
      %cst_53 = arith.constant dense<0.000000e+00> : vector<1xf32>
      %66 = vector.multi_reduction <add>, %65, %cst_53 [1, 2] : vector<1x16x16xf32> to vector<1xf32>
      %67 = vector.shape_cast %66 : vector<1xf32> to vector<1x1x1xf32>
      %68 = vector.extract %67[0, 0, 0] : f32 from vector<1x1x1xf32>
      %c0_54 = arith.constant 0 : index
      %c0_55 = arith.constant 0 : index
      %69 = vector.load %arg10[%c0_54, %c0_55] : memref<16x16xf32, #tpu.memory_space<vmem>>, vector<16x16xf32>
      %70 = vector.shape_cast %69 : vector<16x16xf32> to vector<1x16x16xf32>
      %cst_56 = arith.constant dense<0.000000e+00> : vector<1xf32>
      %71 = vector.multi_reduction <add>, %70, %cst_56 [1, 2] : vector<1x16x16xf32> to vector<1xf32>
      %72 = vector.shape_cast %71 : vector<1xf32> to vector<1x1x1xf32>
      %73 = vector.extract %72[0, 0, 0] : f32 from vector<1x1x1xf32>
      %74 = tpu.iota {dimensions = array<i32: 0>} : vector<8x128xi32>
      %c0_i32_57 = arith.constant 0 : i32
      %75 = vector.broadcast %c0_i32_57 : i32 to vector<8x128xi32>
      %76 = arith.cmpi eq, %74, %75 : vector<8x128xi32>
      %cst_58 = arith.constant 0.000000e+00 : f32
      %77 = vector.broadcast %53 : f32 to vector<8x128xf32>
      %78 = vector.broadcast %cst_58 : f32 to vector<8x128xf32>
      %79 = arith.select %76, %77, %78 : vector<8x128xi1>, vector<8x128xf32>
      %c1_i32 = arith.constant 1 : i32
      %80 = vector.broadcast %c1_i32 : i32 to vector<8x128xi32>
      %81 = arith.cmpi eq, %74, %80 : vector<8x128xi32>
      %cst_59 = arith.constant 0.000000e+00 : f32
      %82 = vector.broadcast %58 : f32 to vector<8x128xf32>
      %83 = vector.broadcast %cst_59 : f32 to vector<8x128xf32>
      %84 = arith.select %81, %82, %83 : vector<8x128xi1>, vector<8x128xf32>
      %85 = arith.addf %79, %84 : vector<8x128xf32>
      %c2_i32 = arith.constant 2 : i32
      %86 = vector.broadcast %c2_i32 : i32 to vector<8x128xi32>
      %87 = arith.cmpi eq, %74, %86 : vector<8x128xi32>
      %cst_60 = arith.constant 0.000000e+00 : f32
      %88 = vector.broadcast %63 : f32 to vector<8x128xf32>
      %89 = vector.broadcast %cst_60 : f32 to vector<8x128xf32>
      %90 = arith.select %87, %88, %89 : vector<8x128xi1>, vector<8x128xf32>
      %91 = arith.addf %85, %90 : vector<8x128xf32>
      %c3_i32 = arith.constant 3 : i32
      %92 = vector.broadcast %c3_i32 : i32 to vector<8x128xi32>
      %93 = arith.cmpi eq, %74, %92 : vector<8x128xi32>
      %cst_61 = arith.constant 0.000000e+00 : f32
      %94 = vector.broadcast %68 : f32 to vector<8x128xf32>
      %95 = vector.broadcast %cst_61 : f32 to vector<8x128xf32>
      %96 = arith.select %93, %94, %95 : vector<8x128xi1>, vector<8x128xf32>
      %97 = arith.addf %91, %96 : vector<8x128xf32>
      %c4_i32 = arith.constant 4 : i32
      %98 = vector.broadcast %c4_i32 : i32 to vector<8x128xi32>
      %99 = arith.cmpi eq, %74, %98 : vector<8x128xi32>
      %cst_62 = arith.constant 0.000000e+00 : f32
      %100 = vector.broadcast %73 : f32 to vector<8x128xf32>
      %101 = vector.broadcast %cst_62 : f32 to vector<8x128xf32>
      %102 = arith.select %99, %100, %101 : vector<8x128xi1>, vector<8x128xf32>
      %103 = arith.addf %97, %102 : vector<8x128xf32>
      %c0_63 = arith.constant 0 : index
      %c0_64 = arith.constant 0 : index
      %c0_65 = arith.constant 0 : index
      %104 = vector.load %arg5[%c0_63, %c0_64, %c0_65] : memref<1x8x128xf32, #tpu.memory_space<vmem>>, vector<1x8x128xf32>
      %105 = vector.shape_cast %104 : vector<1x8x128xf32> to vector<8x128xf32>
      %106 = vector.shape_cast %103 : vector<8x128xf32> to vector<1x8x128xf32>
      tpu.vector_store %arg5[%c0_63, %c0_64, %c0_65], %106 {strides = array<i32>} : memref<1x8x128xf32, #tpu.memory_space<vmem>>, vector<1x8x128xf32>,
    } else {
    }
    return
  }
  func.func @transform_0(%arg0: i32, %arg1: i32) -> (i32, i32, i32) {
    %c0_i32 = arith.constant 0 : i32
    %c0_i32_0 = arith.constant 0 : i32
    return %arg0, %arg1, %c0_i32 : i32, i32, i32
  }
  func.func @transform_1(%arg0: i32, %arg1: i32) -> (i32, i32, i32, i32) {
    %c0_i32 = arith.constant 0 : i32
    %c0_i32_0 = arith.constant 0 : i32
    %c0_i32_1 = arith.constant 0 : i32
    return %arg0, %c0_i32, %arg1, %c0_i32_0 : i32, i32, i32, i32
  }
  func.func @transform_2(%arg0: i32, %arg1: i32) -> (i32, i32, i32) {
    %c0_i32 = arith.constant 0 : i32
    %c0_i32_0 = arith.constant 0 : i32
    return %arg0, %arg1, %c0_i32 : i32, i32, i32
  }
  func.func @transform_3(%arg0: i32, %arg1: i32) -> (i32, i32, i32) {
    %c0_i32 = arith.constant 0 : i32
    %c0_i32_0 = arith.constant 0 : i32
    %c0_i32_1 = arith.constant 0 : i32
    return %arg0, %c0_i32, %c0_i32_0 : i32, i32, i32
  }
}

</mosaic_0001>

<bundles_post_ra>
// kernel: gscore_forward.1
= control target key start
LH: loop header
LB: loop body
LE: loop exit
PB: predicated region body
PF: predicated region fallthrough
CT: control target
= control target key end

     0   :  { %s1041_s0 = inlined_call_operand.hbm [shape: f32[2,16,16], index: 0, kind: input, shape index: {}]   ;;  %s1042_s1 = inlined_call_operand.hbm [shape: f32[2,2,16,16], index: 1, kind: input, shape index: {}]   ;;  %s1043_s2 = inlined_call_operand.hbm [shape: f32[2,16,16], index: 2, kind: input, shape index: {}]   ;;  %s1044_s3 = inlined_call_operand.vmem [shape: f32[2,8,128], index: 3, kind: output, shape index: {}]  }
   0x1   :  { %1047 = sst [smem:[#allocation15_spill]] %s1042_s1 }
   0x2   :  { %8 = vsyncpa [#allocation8], 0 }
   0x3   :  { %10 = vsyncpa [#allocation8 + $0x1], 0 }
   0x4   :  { %11 = vsyncpa [#allocation10], 0 }
   0x5   :  { %13 = vsyncpa [#allocation10 + $0x1], 0  ;;  %s870_s12 = smov 0   ;;  %s872_s13 = smov 0  }
   0x6   :  { %s874_s14 = smov 0   ;;  %s876_s15 = smov 0  }
   0x7   :  { %s878_s16 = smov 0   ;;  %s880_s17 = smov 0  }
   0x8 LB: > { %s1045_s18 = sadd.s32 4294967295, %s845_s17   ;;  %s31_s19 = sadd.s32 1, %s841_s16  ;;  %s845_s17 = sphi %s880_s17, %s19_s17   ;;  %s841_s16 = sphi %s878_s16, %s1059_s16   ;;  %s837_s15 = sphi %s876_s15, %s1058_s15   ;;  %s833_s14 = sphi %s874_s14, %s1057_s14   ;;  %s829_s13 = sphi %s872_s13, %s1056_s13   ;;  %s825_s12 = sphi %s870_s12, %s1055_s12  }
   0x9   : > { %p33_p0 = scmp.ge.s32.totalorder %s31_s19, 2  ;;  %s40_s20 = sadd.s32 1, %s833_s14 }
   0xa   : > { %p47_p1 = scmp.ne.s32.totalorder %s833_s14, %s829_s13  ;;  %p48_p2 = scmp.eq.s32.totalorder %s845_s17, 0 }
   0xb   : > { %s1061_s19 = smov (%p33_p0, %s31_s19), 0  ;;  %p53_p4 = scmp.ne.s32.totalorder %s829_s13, %s825_s12 }
   0xc   : > { %1048 = sst [smem:[#allocation14_spill]] %s1061_s19  ;;  %p49_p3 = por %p48_p2, %p47_p1 }
   0xd   : > { %s35_s21 = ssub.s32 %s841_s16, %s1061_s19  ;;  %p54_p5 = scmp.eq.s32.totalorder %s1045_s18, 0 }
   0xe   : > { %p38_p6 = scmp.eq.s32.totalorder %s35_s21, 0  ;;  %p649_p8 = scmp.lt.s32.totalorder %s845_s17, 2 }
   0xf   : > { %p911_p7 = por %p54_p5, %p53_p4  ;;  %s920_s24 = sand.u32 1, %s833_s14  }
  0x10   : > { %s917_s23 = scalar_select %p38_p6, %s833_s14, %s40_s20  }
  0x11   : > { %p922_p9 = pnand %p649_p8, %p49_p3  ;;  %s183_s26 = sand.u32 1, %s845_s17  }
  0x12   : > { %s605_s27 = sshll.u32 %s920_s24, 5  ;;  %s621_s28 = sshll.u32 %s841_s16, 5 }
  0x13   : > { %s1051_s1 = sld [smem:[#allocation15_spill]]  ;;  %s187_s5 = scalar_lea.vmem [#allocation9], %s605_s27 }
  0x14   : > { %s197_s6 = sshll.u32 %s187_s5, 4  ;;  %p611_p10 = scmp.ge.s32.totalorder %s845_s17, 1  ;;  %s198_s6 = int_to_ptr.vmem [resolvable:$true] %s197_s6 }
  0x15   : > { %s184_s8 = scalar_lea.sflag [#allocation10], %s183_s26  ;;  %s847_s9 = smov 128  }
  0x16   : > { %s848_s10 = smov 8   ;;  %p229_p11 = scmp.lt.s32.totalorder %s845_s17, 3 }
  0x17   : > { %s602_s12 = sshll.u32 %s920_s24, 4  ;;  %s620_s20 = sshll.u32 %s841_s16, 4 }
  0x18   : > { %p936_p12 = pnand %p611_p10, %p229_p11  ;;  %s163_s29 = scalar_lea.vmem [#allocation7], %s602_s12 }
  0x19   : > { %s194_s4 = scalar_lea.hbm %s1051_s1, %s621_s28  ;;  %s170_s28 = scalar_lea.hbm %s1041_s0, %s620_s20 }
  0x1a   : > { %s195_s7 = sshll.u32 %s194_s4, 4  ;;  %s173_s30 = sshll.u32 %s163_s29, 4  ;;  %s196_s7 = int_to_ptr.hbm [resolvable:$true] %s195_s7  ;;  %s174_s30 = int_to_ptr.vmem [resolvable:$true] %s173_s30 }
  0x1b   : > { %645 = dma.hbm_to_vmem [thread:$0]  (!%p922_p9), %s196_s7, 512, %s198_s6, %s184_s8, %s847_s9, %s847_s9, %s848_s10  }
  0x1c   : > { %s171_s4 = sshll.u32 %s170_s28, 4  ;;  %s160_s26 = scalar_lea.sflag [#allocation8], %s920_s24  ;;  %s172_s4 = int_to_ptr.hbm [resolvable:$true] %s171_s4 }
  0x1d   : > { %642 = dma.hbm_to_vmem [thread:$0]  (!%p922_p9), %s172_s4, 256, %s174_s30, %s160_s26, %s847_s9, %s847_s9, %s848_s10  }
  0x1e   : > { %s218_s7 = scalar_lea.hbm %s1043_s2, %s620_s20  ;;  %s211_s18 = scalar_lea.vmem [#allocation11], %s602_s12 }
  0x1f   : > { %s221_s1 = sshll.u32 %s211_s18, 4  ;;  %s219_s19 = sshll.u32 %s218_s7, 4  ;;  %s222_s1 = int_to_ptr.vmem [resolvable:$true] %s221_s1  ;;  %s220_s19 = int_to_ptr.hbm [resolvable:$true] %s219_s19 }
  0x20   : > { %648 = dma.hbm_to_vmem [thread:$0]  (!%p922_p9), %s220_s19, 256, %s222_s1, %s184_s8, %s847_s9, %s847_s9, %s848_s10  }
  0x21   : > { %233 = sbr.rel (%p936_p12) target bundleno = 263 (0x107), region = 32  ;;  %s235_s21 = sand.u32 (!%p936_p12), 1, %s829_s13  }
  0x22   : > { %s612_s24 = sshll.u32 (!%p936_p12), %s235_s21, 4  ;;  %s236_s27 = scalar_lea.sflag (!%p936_p12), [#allocation8], %s235_s21 }
  0x23   : > { %s239_s28 = scalar_lea.vmem (!%p936_p12), [#allocation7], %s612_s24 }
  0x26   : > { %816 = dma.done.wait (%p911_p7), %s236_s27, 256  }
  0x27   : > { %818 = vsyncadd (%p911_p7), %s236_s27, 4294967040  ;;  %s1053_s18 = sadd.s32 4294967295, %s845_s17   ;;  %s613_s25 = sshll.u32 %s235_s21, 5 }
  0x28   : > { %s245_s12 = sand.u32 1, %s1053_s18   ;;  %s249_s19 = scalar_lea.vmem [#allocation9], %s613_s25 }
  0x29   : > { %s246_s1 = scalar_lea.sflag [#allocation10], %s245_s12 }
  0x2a   : > { %820 = dma.done.wait (%p911_p7), %s246_s1, 768  }
  0x2b   : > { %822 = vsyncadd (%p911_p7), %s246_s1, 4294966528  ;;  %vm303_vm0 = vcmask 130048   ;;  %v849_v0 = vmov 0.0   ;;  %s259_s8 = scalar_lea.vmem [#allocation11], %s612_s24  ;;  %v314_v3 = vld [vmem:[%s239_s28] sm:$0xff]  ;;  %v315_v5 = vld [vmem:[%s239_s28 + $0x8] sm:$0xff] }
  0x2c   : > { %304 = vst.msk [vmem:[#allocation2] sm:$0xff] %vm303_vm0, %v849_v0  ;;  %v972_v1 = vld [vmem:[%s259_s8] sm:$0xff]  ;;  %v974_v2 = vld [vmem:[%s259_s8 + $0x8] sm:$0xff]  ;;  %vm329_vm1 = vcmp.eq.f32.partialorder %v314_v3, 0.0  ;;  %vm330_vm2 = vcmp.eq.f32.partialorder %v315_v5, 0.0  ;;  %vm327_vm4 = vcmp.eq.f32.partialorder %v314_v3, 1.0 }
  0x2d   : > { %305 = vst.msk [vmem:[#allocation2 + $0x8] sm:$0xff] %vm303_vm0, %v849_v0  ;;  %v318_v6 = vld [vmem:[%s249_s19] sm:$0xff]  ;;  %v319_v9 = vld [vmem:[%s249_s19 + $0x8] sm:$0xff]  ;;  %v616_v10 = vld [vmem:[%s249_s19 + $0x10] sm:$0xff]  ;;  %vm328_vm7 = vcmp.eq.f32.partialorder %v315_v5, 1.0  ;;  %p295_p13 = scmp.lt.s32.totalorder %s837_s15, 1 }
  0x2e   : > { %306 = vst.msk [vmem:[#allocation3] sm:$0xff] %vm303_vm0, %v849_v0  ;;  %v617_v12 = vld [vmem:[%s249_s19 + $0x18] sm:$0xff]  ;;  %vm325_vm3 = vcmp.lt.f32.partialorder %v616_v10, %v318_v6  ;;  %vm323_vm9 = vcmp.gt.f32.partialorder %v616_v10, %v318_v6 }
  0x2f   : > { %307 = vst.msk [vmem:[#allocation3 + $0x8] sm:$0xff] %vm303_vm0, %v849_v0  ;;  %vm326_vm5 = vcmp.lt.f32.partialorder %v617_v12, %v319_v9  ;;  %vm350_vm6 = vmand %vm325_vm3, %vm329_vm1  ;;  %vm324_vm11 = vcmp.gt.f32.partialorder %v617_v12, %v319_v9  ;;  %s1063_s15 = smov (!%p295_p13, %s837_s15), 1 }
  0x30   : > { %308 = vst.msk [vmem:[#allocation4] sm:$0xff] %vm303_vm0, %v849_v0  ;;  %vm351_vm8 = vmand %vm326_vm5, %vm330_vm2  ;;  %v352_v14 = vsel %vm350_vm6, %v972_v1, 0.0  ;;  %s615_s29 = sshll.u32 %s1063_s15, 3 }
  0x31   : > { %309 = vst.msk [vmem:[#allocation4 + $0x8] sm:$0xff] %vm303_vm0, %v849_v0  ;;  %v353_v16 = vsel %vm351_vm8, %v974_v2, 0.0  ;;  %vm370_vm10 = vmand %vm325_vm3, %vm327_vm4  ;;  %s298_s26 = scalar_lea.vmem %s1044_s3, %s615_s29 }
  0x32   : > { %310 = vst.msk [vmem:[#allocation5] sm:$0xff] %vm303_vm0, %v849_v0  ;;  %vm371_vm12 = vmand %vm326_vm5, %vm328_vm7  ;;  %v372_v19 = vsel %vm370_vm10, 1.0, %v849_v0 }
  0x33   : > { %v331_v4 = vld [vmem:[#allocation2] sm:$0xff]  ;;  %311 = vst.msk [vmem:[#allocation5 + $0x8] sm:$0xff] %vm303_vm0, %v849_v0  ;;  %v373_v21 = vsel %vm371_vm12, 1.0, %v849_v0  ;;  %vm340_vm13 = vmand %vm323_vm9, %vm327_vm4 }
  0x34   : > { %v332_v7 = vld [vmem:[#allocation2 + $0x8] sm:$0xff]  ;;  %v333_v8 = vadd.f32 %v331_v4, %v972_v1  ;;  %312 = vst.msk [vmem:[#allocation6] sm:$0xff] %vm303_vm0, %v849_v0  ;;  %vm341_vm14 = vmand %vm324_vm11, %vm328_vm7  ;;  %v342_v24 = vsel %vm340_vm13, 1.0, %v849_v0 }
  0x35   : > { %v334_v11 = vadd.f32 %v332_v7, %v974_v2  ;;  %313 = vst.msk [vmem:[#allocation6 + $0x8] sm:$0xff] %vm303_vm0, %v849_v0  ;;  %v338_v20 = vld [vmem:[#allocation3] sm:$0xff]  ;;  %v343_v28 = vsel %vm341_vm14, 1.0, %v849_v0  ;;  %vm360_vm15 = vmand %vm323_vm9, %vm329_vm1 }
  0x36   : > { %336 = vst.msk [vmem:[#allocation2] sm:$0xff] %vm303_vm0, %v333_v8  ;;  %v339_v22 = vld [vmem:[#allocation3 + $0x8] sm:$0xff]  ;;  %v344_v29 = vadd.f32 %v342_v24, %v338_v20  ;;  %vm361_vm3 = vmand %vm324_vm11, %vm330_vm2  ;;  %v362_v34 = vsel %vm360_vm15, %v972_v1, 0.0 }
  0x37   : > { %337 = vst.msk [vmem:[#allocation2 + $0x8] sm:$0xff] %vm303_vm0, %v334_v11  ;;  %v348_v13 = vld [vmem:[#allocation4] sm:$0xff]  ;;  %v345_v33 = vadd.f32 %v343_v28, %v339_v22  ;;  %v363_v37 = vsel %vm361_vm3, %v974_v2, 0.0 }
  0x38   : > { %v349_v15 = vld [vmem:[#allocation4 + $0x8] sm:$0xff]  ;;  %v354_v17 = vadd.f32 %v352_v14, %v348_v13  ;;  %346 = vst.msk [vmem:[#allocation3] sm:$0xff] %vm303_vm0, %v344_v29 }
  0x39   : > { %v355_v18 = vadd.f32 %v353_v16, %v349_v15  ;;  %v358_v25 = vld [vmem:[#allocation5] sm:$0xff]  ;;  %347 = vst.msk [vmem:[#allocation3 + $0x8] sm:$0xff] %vm303_vm0, %v345_v33  ;;  %v451_v33 = vlaneseq }
  0x3a   : > { %356 = vst.msk [vmem:[#allocation4] sm:$0xff] %vm303_vm0, %v354_v17  ;;  %v359_v30 = vld [vmem:[#allocation5 + $0x8] sm:$0xff]  ;;  %v364_v38 = vadd.f32 %v362_v34, %v358_v25 }
  0x3b   : > { %357 = vst.msk [vmem:[#allocation4 + $0x8] sm:$0xff] %vm303_vm0, %v355_v18  ;;  %v368_v23 = vld [vmem:[#allocation6] sm:$0xff]  ;;  %v365_v40 = vadd.f32 %v363_v37, %v359_v30  ;;  %v452_v34 = vshrl.u32 %v451_v33, 7 }
  0x3c   : > { %v369_v26 = vld [vmem:[#allocation6 + $0x8] sm:$0xff]  ;;  %v374_v27 = vadd.f32 %v372_v19, %v368_v23  ;;  %366 = vst.msk [vmem:[#allocation5] sm:$0xff] %vm303_vm0, %v364_v38 }
  0x3d   : > { %v381_v31 = vld [vmem:[#allocation2] sm:$0xff]  ;;  %v375_v32 = vadd.f32 %v373_v21, %v369_v26  ;;  %367 = vst.msk [vmem:[#allocation5 + $0x8] sm:$0xff] %vm303_vm0, %v365_v40  ;;  %vm456_vm1 = vcmp.eq.s32.totalorder %v452_v34, 1  ;;  %vm460_vm2 = vcmp.eq.s32.totalorder %v452_v34, 2  ;;  %vm464_vm4 = vcmp.eq.s32.totalorder %v452_v34, 3 }
  0x3e   : > { %v382_v35 = vld [vmem:[#allocation2 + $0x8] sm:$0xff]  ;;  %v383_v36 = vsel %vm303_vm0, %v381_v31, 0.0  ;;  %376 = vst.msk [vmem:[#allocation6] sm:$0xff] %vm303_vm0, %v374_v27  ;;  %vm468_vm5 = vcmp.eq.s32.totalorder %v452_v34, 4 }
  0x3f   : > { %v384_v39 = vsel %vm303_vm0, %v382_v35, 0.0  ;;  %377 = vst.msk [vmem:[#allocation6 + $0x8] sm:$0xff] %vm303_vm0, %v375_v32  ;;  %v395_v51 = vld [vmem:[#allocation3] sm:$0xff] }
  0x40   : > { %v385_v41 = vadd.f32 %v384_v39, %v383_v36  ;;  %v396_v53 = vld [vmem:[#allocation3 + $0x8] sm:$0xff]  ;;  %v397_v54 = vsel %vm303_vm0, %v395_v51, 0.0 }
  0x41   : > { %v409_v42 = vld [vmem:[#allocation4] sm:$0xff]  ;;  %v398_v55 = vsel %vm303_vm0, %v396_v53, 0.0 }
  0x42   : > { %386 = vadd.xlane.f32.xlu0 %v385_v41  ;;  %v410_v43 = vld [vmem:[#allocation4 + $0x8] sm:$0xff]  ;;  %v411_v44 = vsel %vm303_vm0, %v409_v42, 0.0  ;;  %v399_v57 = vadd.f32 %v398_v55, %v397_v54 }
  0x43   : > { %v412_v45 = vsel %vm303_vm0, %v410_v43, 0.0  ;;  %v423_v56 = vld [vmem:[#allocation5] sm:$0xff] }
  0x44   : > { %v413_v46 = vadd.f32 %v412_v45, %v411_v44  ;;  %v424_v58 = vld [vmem:[#allocation5 + $0x8] sm:$0xff]  ;;  %v425_v59 = vsel %vm303_vm0, %v423_v56, 0.0 }
  0x45   : > { %v437_v47 = vld [vmem:[#allocation6] sm:$0xff]  ;;  %v426_v60 = vsel %vm303_vm0, %v424_v58, 0.0 }
  0x46   : > { %414 = vadd.xlane.f32.xlu1 %v413_v46  ;;  %v438_v48 = vld [vmem:[#allocation6 + $0x8] sm:$0xff]  ;;  %v439_v49 = vsel %vm303_vm0, %v437_v47, 0.0  ;;  %v427_v61 = vadd.f32 %v426_v60, %v425_v59 }
  0x47   : > { %v440_v50 = vsel %vm303_vm0, %v438_v48, 0.0  ;;  %vm453_vm0 = vcmp.eq.s32.totalorder %v452_v34, 0 }
  0x48   : > { %v441_v52 = vadd.f32 %v440_v50, %v439_v49 }
  0x4a   : > { %442 = vadd.xlane.f32.xlu2 %v441_v52  ;;  %400 = vadd.xlane.f32.xlu0 %v399_v57 }
  0x4e   : > { %428 = vadd.xlane.f32.xlu1 %v427_v61 }
  0xb5   : > { %v387_v62 = vpop.xlane.xlu0 %386 }
  0xb6   : > { %v388_v63 = vrot.slane %v387_v62, 4 }
  0xb8   : > { %v389_v0 = vadd.f32 %v388_v63, %v387_v62 }
  0xb9   : > { %v415_v1 = vpop.xlane.xlu1 %414 }
  0xba   : > { %v390_v2 = vrot.slane %v389_v0, 2  ;;  %v416_v3 = vrot.slane %v415_v1, 4 }
  0xbc   : > { %v417_v4 = vadd.f32 %v416_v3, %v415_v1  ;;  %v391_v5 = vadd.f32 %v390_v2, %v389_v0 }
  0xbd   : > { %v443_v6 = vpop.xlane.xlu2 %442  ;;  %v401_v10 = vpop.xlane.xlu0 %400 }
  0xbe   : > { %v444_v7 = vrot.slane %v443_v6, 4  ;;  %v392_v8 = vrot.slane %v391_v5, 1  ;;  %v418_v9 = vrot.slane %v417_v4, 2  ;;  %v402_v12 = vrot.slane %v401_v10, 4 }
  0xc0   : > { %v445_v11 = vadd.f32 %v444_v7, %v443_v6  ;;  %v393_v13 = vadd.f32 %v392_v8, %v391_v5  ;;  %v403_v16 = vadd.f32 %v402_v12, %v401_v10  ;;  %v419_v18 = vadd.f32 %v418_v9, %v417_v4 }
  0xc1   : > { %v429_v14 = vpop.xlane.xlu1 %428 }
  0xc2   : > { %v446_v15 = vrot.slane %v445_v11, 2  ;;  %v430_v17 = vrot.slane %v429_v14, 4  ;;  %623 = vpush %v393_v13  ;;  %v404_v19 = vrot.slane %v403_v16, 2  ;;  %v420_v24 = vrot.slane %v419_v18, 1 }
  0xc4   : > { %v431_v20 = vadd.f32 %v430_v17, %v429_v14  ;;  %v447_v21 = vadd.f32 %v446_v15, %v445_v11  ;;  %v405_v22 = vadd.f32 %v404_v19, %v403_v16  ;;  %v421_v30 = vadd.f32 %v420_v24, %v419_v18 }
  0xc6   : > { %v432_v23 = vrot.slane %v431_v20, 2  ;;  %v406_v26 = vrot.slane %v405_v22, 1  ;;  %v448_v27 = vrot.slane %v447_v21, 1 }
  0xc8   : > { %v433_v25 = vadd.f32 %v432_v23, %v431_v20  ;;  %v407_v28 = vadd.f32 %v406_v26, %v405_v22  ;;  %v449_v32 = vadd.f32 %v448_v27, %v447_v21 }
  0xca   : > { %v434_v29 = vrot.slane %v433_v25, 1  ;;  %625 = vpush %v407_v28 }
  0xcb   : > { %627 = vpush %v421_v30 }
  0xcc   : > { %v435_v31 = vadd.f32 %v434_v29, %v433_v25 }
  0xce   : > { %629 = vpush %v435_v31 }
  0xcf   : > { %631 = vpush %v449_v32 }
  0xf3   : > { %s624_s22 = spop %623 }
  0xf4   : > { %v454_v35 = vstv %s624_s22 }
  0xf5   : > { %v455_v37 = vsel %vm453_vm0, %v454_v35, 0.0 }
  0xfb   : > { %s626_s9 = spop %625 }
  0xfc   : > { %v457_v36 = vstv %s626_s9  ;;  %s628_s10 = spop %627 }
  0xfd   : > { %v458_v38 = vsel %vm456_vm1, %v457_v36, 0.0  ;;  %v461_v39 = vstv %s628_s10 }
  0xfe   : > { %v459_v40 = vadd.f32 %v458_v38, %v455_v37  ;;  %v462_v42 = vsel %vm460_vm2, %v461_v39, 0.0 }
  0xff   : > { %s630_s11 = spop %629 }
 0x100   : > { %v465_v41 = vstv %s630_s11  ;;  %s632_s20 = spop %631  ;;  %v463_v43 = vadd.f32 %v462_v42, %v459_v40 }
 0x101   : > { %v469_v44 = vstv %s632_s20  ;;  %v466_v45 = vsel %vm464_vm4, %v465_v41, 0.0 }
 0x102   : > { %v467_v46 = vadd.f32 %v466_v45, %v463_v43  ;;  %v470_v47 = vsel %vm468_vm5, %v469_v44, 0.0 }
 0x104   : > { %v471_v48 = vadd.f32 %v470_v47, %v467_v46 }
 0x106   : > { %472 = vst [vmem:[%s298_s26] sm:$0xff] %v471_v48 }
 0x107 PF: > { %s19_s17 = sadd.s32 1, %s845_s17   ;;  %s1054_s5 = sld [smem:[#allocation14_spill]] }
 0x108   : > { %p16_p0 = scmp.ge.s32.totalorder %s19_s17, 4   ;;  %s1055_s12 = smov %s829_s13 }
 0x109   : > { %s1056_s13 = smov %s833_s14  ;;  %s1057_s14 = smov %s917_s23 }
 0x10a   : > { %s1058_s15 = smov %s841_s16  ;;  %18 = sbr.rel (!%p16_p0) target bundleno = 8 (0x8), region = 105 }
 0x10d   : > { %s1059_s16 = smov %s1054_s5 }
 0x10f   :  { %492 = vsyncpa [#allocation8], 1 }
 0x110   :  { %494 = vsyncpa [#allocation8 + $0x1], 1 }
 0x111   :  { %495 = vsyncpa [#allocation10], 1 }
 0x112   :  { %497 = vsyncpa [#allocation10 + $0x1], 1 }

</bundles_post_ra>
